<compile_context>
chip_gen: v6e
topology: v6e:2x2x1
jax: 0.10.0
libtpu: 0.0.40
codegen_flags: <defaults>
</compile_context>

<pallas_src>
import functools
import math

import jax
import jax.numpy as jnp
from jax.experimental import pallas as pl
from jax.experimental.pallas import tpu as pltpu


def _round_up(x, m):
    return ((x + m - 1) // m) * m


def ffn_kernel(x_ref, gamma_ref, beta_ref, w1_ref, b1_ref, w2_ref, b2_ref, o_ref,
               xn_ref, acc_ref, *, d_valid, approximate_gelu):
    j = pl.program_id(1)

    # ---- LayerNorm once per row tile (j == 0): fused single-pass stats ----
    @pl.when(j == 0)
    def _():
        x = x_ref[...].astype(jnp.float32)               # padded lanes are zero
        inv_d = 1.0 / d_valid
        s1 = jnp.sum(x, axis=-1, keepdims=True)
        s2 = jnp.sum(x * x, axis=-1, keepdims=True)
        mean = s1 * inv_d
        var = jnp.maximum(s2 * inv_d - mean * mean, 0.0)
        xn = (x - mean) * jax.lax.rsqrt(var + 1e-5)
        # gamma/beta are zero in padded lanes -> padded lanes of xn_ref are zero.
        xn_ref[...] = (xn * gamma_ref[...].astype(jnp.float32)
                       + beta_ref[...].astype(jnp.float32)).astype(jnp.bfloat16)
        acc_ref[...] = jnp.zeros_like(acc_ref)

    # ---- Linear 1 chunk (D -> tn) + bias + GELU (elementwise on the chunk) ----
    h = jnp.dot(xn_ref[...], w1_ref[...], preferred_element_type=jnp.float32)
    h = h + b1_ref[...].astype(jnp.float32)
    if approximate_gelu:
        # tanh approximation: tanh goes to the EUP slot; keeps the kernel MXU-bound.
        c = math.sqrt(2.0 / math.pi)
        h = 0.5 * h * (1.0 + jnp.tanh(c * (h + 0.044715 * (h * h * h))))
    else:
        # exact erf (torch nn.GELU default) — heavier f32 VALU polynomial.
        h = 0.5 * h * (1.0 + jax.lax.erf(h * (1.0 / math.sqrt(2.0))))

    # ---- Linear 2 chunk (tn -> D): accumulate in f32 ----
    acc_ref[...] += jnp.dot(h.astype(jnp.bfloat16), w2_ref[...],
                            preferred_element_type=jnp.float32)

    # ---- Finalize: add bias2, cast, store (dropout p=0 -> no-op) ----
    @pl.when(j == pl.num_programs(1) - 1)
    def _():
        out = acc_ref[...] + b2_ref[...].astype(jnp.float32)
        o_ref[...] = out.astype(o_ref.dtype)


def _vmem_limit_bytes(need):
    """Generation-aware VMEM request: ~80% of physical per-TC capacity."""
    try:
        phys = int(pltpu.get_tpu_info().vmem_capacity_bytes)
    except Exception:  # non-TPU backend / older jax: conservative per-TC default
        phys = 64 * 2**20
    cap = (phys * 4) // 5            # leave headroom for compiler internal scratch
    return int(min(cap, max(32 * 2**20, (need * 3) // 2)))


def feedforward_pallas(x, gamma, beta, w1, b1, w2, b2, *, tm=512, tn=512,
                       approximate_gelu=True):
    """x: (B, S, D). gamma/beta: (D,). w1: (D, inner). b1: (inner,).
    w2: (inner, D). b2: (D,). Returns (B, S, D) bf16."""
    B, S, D = x.shape
    inner = w1.shape[1]
    M = B * S

    # Lane-align feature dims (128); tile token dim (multiple of 8) and inner dim.
    # TODO(synk): on v6e/v7x a 256 lane/K alignment can help MXU occupancy for odd D.
    Dp = _round_up(D, 128)
    tn = _round_up(max(128, min(tn, _round_up(inner, 128))), 128)
    Np = _round_up(inner, tn)

    tm = _round_up(max(8, min(tm, M)), 8)
    # Give both v7x TensorCores work: aim for >= 2 row blocks when M allows it.
    if M > 8 and pl.cdiv(M, tm) < 2:
        tm = _round_up(pl.cdiv(M, 2), 8)
    Mp = _round_up(M, tm)
    grid = (Mp // tm, Np // tn)

    # --- prepare operands: cast/pad only when actually needed ---
    def _as_bf16(a):
        return a if a.dtype == jnp.bfloat16 else a.astype(jnp.bfloat16)

    x2 = _as_bf16(x.reshape(M, D))           # torch LayerNorm casts input to bf16
    if Mp != M or Dp != D:
        x2 = jnp.pad(x2, ((0, Mp - M), (0, Dp - D)))

    def _vec(v, n, npad):
        v = _as_bf16(v.reshape(1, n))
        return v if npad == n else jnp.pad(v, ((0, 0), (0, npad - n)))

    def _mat(w, r, c, rpad, cpad):
        w = _as_bf16(w)
        return w if (rpad == r and cpad == c) else jnp.pad(w, ((0, rpad - r), (0, cpad - c)))

    gamma_p = _vec(gamma, D, Dp)
    beta_p = _vec(beta, D, Dp)
    b1_p = _vec(b1, inner, Np)
    b2_p = _vec(b2, D, Dp)
    w1_p = _mat(w1, D, inner, Dp, Np)
    w2_p = _mat(w2, inner, D, Np, Dp)

    # --- VMEM budget (streamed weight chunks are double-buffered) ---
    need = (2 * tm * Dp * 2                       # x tile (x2 buffers, bf16)
            + 2 * tm * Dp * 2                     # out tile (x2 buffers, bf16)
            + 2 * (Dp * tn + tn * Dp + tn) * 2    # w1/b1/w2 chunks (x2 buffers, bf16)
            + 2 * 3 * Dp * 2                      # gamma/beta/b2 (x2 buffers, bf16)
            + tm * Dp * 2                         # xn scratch (bf16)
            + tm * Dp * 4                         # f32 accumulator scratch
            + 3 * tm * tn * 4                     # live f32 h chunk + GELU temporaries
            + 2 * tm * Dp * 4)                    # LN f32 temporaries
    vmem_limit = _vmem_limit_bytes(need)

    kernel = functools.partial(ffn_kernel, d_valid=D, approximate_gelu=approximate_gelu)

    out = pl.pallas_call(
        kernel,
        out_shape=jax.ShapeDtypeStruct((Mp, Dp), jnp.bfloat16),
        grid_spec=pltpu.PrefetchScalarGridSpec(
            num_scalar_prefetch=0,
            grid=grid,
            in_specs=[
                pl.BlockSpec((tm, Dp), lambda i, j: (i, 0)),    # x rows (resident over j)
                pl.BlockSpec((1, Dp), lambda i, j: (0, 0)),     # gamma
                pl.BlockSpec((1, Dp), lambda i, j: (0, 0)),     # beta
                pl.BlockSpec((Dp, tn), lambda i, j: (0, j)),    # w1 column chunk (streamed)
                pl.BlockSpec((1, tn), lambda i, j: (0, j)),     # b1 chunk
                pl.BlockSpec((tn, Dp), lambda i, j: (j, 0)),    # w2 row chunk (streamed)
                pl.BlockSpec((1, Dp), lambda i, j: (0, 0)),     # b2
            ],
            out_specs=pl.BlockSpec((tm, Dp), lambda i, j: (i, 0)),
            scratch_shapes=[
                pltpu.VMEM((tm, Dp), jnp.bfloat16),             # LayerNorm output cache
                pltpu.VMEM((tm, Dp), jnp.float32),              # f32 output accumulator
            ],
        ),
        compiler_params=pltpu.CompilerParams(
            dimension_semantics=("parallel", "arbitrary"),
            vmem_limit_bytes=vmem_limit,
        ),
    )(x2, gamma_p, beta_p, w1_p, b1_p, w2_p, b2_p)

    if Mp != M or Dp != D:
        out = out[:M, :D]
    return out.reshape(B, S, D)


def init_params(key, dim, mult=4):
    """Shapes/init matching the torch module (Linear: U(-1/sqrt(fan_in), +)); weights (in, out)."""
    inner = int(dim * mult)
    k1, k2, k3, k4 = jax.random.split(key, 4)
    gamma = jnp.ones((dim,), dtype=jnp.bfloat16)
    beta = jnp.zeros((dim,), dtype=jnp.bfloat16)
    bound1 = 1.0 / math.sqrt(dim)
    w1 = jax.random.uniform(k1, (dim, inner), jnp.float32, -bound1, bound1).astype(jnp.bfloat16)
    b1 = jax.random.uniform(k2, (inner,), jnp.float32, -bound1, bound1).astype(jnp.bfloat16)
    bound2 = 1.0 / math.sqrt(inner)
    w2 = jax.random.uniform(k3, (inner, dim), jnp.float32, -bound2, bound2).astype(jnp.bfloat16)
    b2 = jax.random.uniform(k4, (dim,), jnp.float32, -bound2, bound2).astype(jnp.bfloat16)
    return gamma, beta, w1, b1, w2, b2


if __name__ == "__main__":
    key = jax.random.PRNGKey(0)
    kx, kp = jax.random.split(key)

    # Small demo shapes: M = 18 is not a tile multiple, D = 32 is not lane-aligned,
    # and inner = 256 with tn = 128 exercises the 2-chunk reduction (accumulator)
    # axis as well as 3 pipelined row blocks.
    B, S, D, MULT = 2, 9, 32, 8          # inner_dim = 256, M = 18
    x = jax.random.normal(kx, (B, S, D), dtype=jnp.float32)
    gamma, beta, w1, b1, w2, b2 = init_params(kp, D, MULT)

    out = feedforward_pallas(x, gamma, beta, w1, b1, w2, b2, tm=8, tn=128,
                             approximate_gelu=True)
    jax.block_until_ready(out)

    # Plain-JAX reference with matching precision / GELU choices (tanh-approx GELU,
    # i.e. torch nn.GELU(approximate='tanh'); exact-erf parity available via
    # approximate_gelu=False).
    xb = x.astype(jnp.bfloat16).astype(jnp.float32)
    mean = jnp.mean(xb, axis=-1, keepdims=True)
    var = jnp.mean((xb - mean) ** 2, axis=-1, keepdims=True)
    xn = (xb - mean) * jax.lax.rsqrt(var + 1e-5)
    xn = (xn * gamma.astype(jnp.float32) + beta.astype(jnp.float32)).astype(jnp.bfloat16)
    h = jnp.dot(xn, w1, preferred_element_type=jnp.float32) + b1.astype(jnp.float32)
    c = math.sqrt(2.0 / math.pi)
    h = 0.5 * h * (1.0 + jnp.tanh(c * (h + 0.044715 * (h * h * h))))
    ref = (jnp.dot(h.astype(jnp.bfloat16), w2, preferred_element_type=jnp.float32)
           + b2.astype(jnp.float32)).astype(jnp.bfloat16)

    assert out.shape == (B, S, D) and out.dtype == jnp.bfloat16
    assert jnp.allclose(out.astype(jnp.float32), ref.astype(jnp.float32),
                        atol=2e-2, rtol=2e-2)
    print("KERNEL_OK")
</pallas_src>

<mosaic_0001>
module attributes {stable_mosaic.version = 11 : i64} {
  func.func @ffn_kernel(%arg0: i32, %arg1: i32, %arg2: memref<8x128xbf16, #tpu.memory_space<vmem>>, %arg3: memref<1x128xbf16, #tpu.memory_space<vmem>>, %arg4: memref<1x128xbf16, #tpu.memory_space<vmem>>, %arg5: memref<128x128xbf16, #tpu.memory_space<vmem>>, %arg6: memref<1x128xbf16, #tpu.memory_space<vmem>>, %arg7: memref<128x128xbf16, #tpu.memory_space<vmem>>, %arg8: memref<1x128xbf16, #tpu.memory_space<vmem>>, %arg9: memref<8x128xbf16, #tpu.memory_space<vmem>>, %arg10: memref<8x128xbf16, #tpu.memory_space<vmem>>, %arg11: memref<8x128xf32, #tpu.memory_space<vmem>>) attributes {dimension_semantics = [#tpu.dimension_semantics<parallel>, #tpu.dimension_semantics<arbitrary>], iteration_bounds = array<i64: 3, 2>, scalar_prefetch = 0 : i64, scratch_operands = 2 : i64, tpu.core_type = #tpu.core_type<tc>, window_params = [{transform_indices = @transform_0, window_bounds = array<i64: 8, 128>}, {pipeline_mode = #tpu.pipeline_mode<synchronous>, transform_indices = @transform_1, window_bounds = array<i64: 1, 128>}, {pipeline_mode = #tpu.pipeline_mode<synchronous>, transform_indices = @transform_2, window_bounds = array<i64: 1, 128>}, {transform_indices = @transform_3, window_bounds = array<i64: 128, 128>}, {transform_indices = @transform_4, window_bounds = array<i64: 1, 128>}, {transform_indices = @transform_5, window_bounds = array<i64: 128, 128>}, {pipeline_mode = #tpu.pipeline_mode<synchronous>, transform_indices = @transform_6, window_bounds = array<i64: 1, 128>}, {transform_indices = @transform_7, window_bounds = array<i64: 8, 128>}]} {
    %c0_i32 = arith.constant 0 : i32
    %0 = arith.cmpi eq, %arg1, %c0_i32 : i32
    %1 = arith.extui %0 : i1 to i32
    %c0_i32_0 = arith.constant 0 : i32
    %2 = arith.cmpi ne, %1, %c0_i32_0 : i32
    scf.if %2 {
      %c0_18 = arith.constant 0 : index
      %c0_19 = arith.constant 0 : index
      %32 = vector.load %arg2[%c0_18, %c0_19] : memref<8x128xbf16, #tpu.memory_space<vmem>>, vector<8x128xbf16>
      %33 = arith.extf %32 : vector<8x128xbf16> to vector<8x128xf32>
      %cst_20 = arith.constant dense<0.000000e+00> : vector<8xf32>
      %34 = vector.multi_reduction <add>, %33, %cst_20 [1] : vector<8x128xf32> to vector<8xf32>
      %35 = vector.shape_cast %34 : vector<8xf32> to vector<8x1xf32>
      %36 = arith.mulf %33, %33 : vector<8x128xf32>
      %cst_21 = arith.constant dense<0.000000e+00> : vector<8xf32>
      %37 = vector.multi_reduction <add>, %36, %cst_21 [1] : vector<8x128xf32> to vector<8xf32>
      %38 = vector.shape_cast %37 : vector<8xf32> to vector<8x1xf32>
      %cst_22 = arith.constant 3.125000e-02 : f32
      %39 = vector.broadcast %cst_22 : f32 to vector<8x1xf32>
      %40 = arith.mulf %35, %39 : vector<8x1xf32>
      %cst_23 = arith.constant 3.125000e-02 : f32
      %41 = vector.broadcast %cst_23 : f32 to vector<8x1xf32>
      %42 = arith.mulf %38, %41 : vector<8x1xf32>
      %43 = arith.mulf %40, %40 : vector<8x1xf32>
      %44 = arith.subf %42, %43 : vector<8x1xf32>
      %cst_24 = arith.constant 0.000000e+00 : f32
      %45 = vector.broadcast %cst_24 : f32 to vector<8x1xf32>
      %46 = arith.maximumf %44, %45 : vector<8x1xf32>
      %47 = vector.broadcast %40 : vector<8x1xf32> to vector<8x128xf32>
      %48 = arith.subf %33, %47 : vector<8x128xf32>
      %cst_25 = arith.constant 9.99999974E-6 : f32
      %49 = vector.broadcast %cst_25 : f32 to vector<8x1xf32>
      %50 = arith.addf %46, %49 : vector<8x1xf32>
      %51 = math.rsqrt %50 : vector<8x1xf32>
      %52 = vector.broadcast %51 : vector<8x1xf32> to vector<8x128xf32>
      %53 = arith.mulf %48, %52 : vector<8x128xf32>
      %c0_26 = arith.constant 0 : index
      %c0_27 = arith.constant 0 : index
      %54 = vector.load %arg3[%c0_26, %c0_27] : memref<1x128xbf16, #tpu.memory_space<vmem>>, vector<1x128xbf16>
      %55 = arith.extf %54 : vector<1x128xbf16> to vector<1x128xf32>
      %56 = vector.broadcast %55 : vector<1x128xf32> to vector<8x128xf32>
      %57 = arith.mulf %53, %56 : vector<8x128xf32>
      %c0_28 = arith.constant 0 : index
      %c0_29 = arith.constant 0 : index
      %58 = vector.load %arg4[%c0_28, %c0_29] : memref<1x128xbf16, #tpu.memory_space<vmem>>, vector<1x128xbf16>
      %59 = arith.extf %58 : vector<1x128xbf16> to vector<1x128xf32>
      %60 = vector.broadcast %59 : vector<1x128xf32> to vector<8x128xf32>
      %61 = arith.addf %57, %60 : vector<8x128xf32>
      %62 = arith.truncf %61 : vector<8x128xf32> to vector<8x128xbf16>
      %c0_30 = arith.constant 0 : index
      %c0_31 = arith.constant 0 : index
      %63 = vector.load %arg10[%c0_30, %c0_31] : memref<8x128xbf16, #tpu.memory_space<vmem>>, vector<8x128xbf16>
      tpu.vector_store %arg10[%c0_30, %c0_31], %62 {strides = array<i32>} : memref<8x128xbf16, #tpu.memory_space<vmem>>, vector<8x128xbf16>,
      %cst_32 = arith.constant 0.000000e+00 : f32
      %64 = vector.broadcast %cst_32 : f32 to vector<8x128xf32>
      %c0_33 = arith.constant 0 : index
      %c0_34 = arith.constant 0 : index
      %65 = vector.load %arg11[%c0_33, %c0_34] : memref<8x128xf32, #tpu.memory_space<vmem>>, vector<8x128xf32>
      tpu.vector_store %arg11[%c0_33, %c0_34], %64 {strides = array<i32>} : memref<8x128xf32, #tpu.memory_space<vmem>>, vector<8x128xf32>,
    } else {
    }
    %c0 = arith.constant 0 : index
    %c0_1 = arith.constant 0 : index
    %3 = vector.load %arg10[%c0, %c0_1] : memref<8x128xbf16, #tpu.memory_space<vmem>>, vector<8x128xbf16>
    %c0_2 = arith.constant 0 : index
    %c0_3 = arith.constant 0 : index
    %4 = vector.load %arg5[%c0_2, %c0_3] : memref<128x128xbf16, #tpu.memory_space<vmem>>, vector<128x128xbf16>
    %cst = arith.constant dense<0.000000e+00> : vector<8x128xf32>
    %5 = tpu.matmul %3, %4, %cst {dimension_numbers = #tpu.dot_dimension_numbers<[1], [0], [0], [1], [0, 0, 1, 1], [], []>} : vector<8x128xbf16>, vector<128x128xbf16>, vector<8x128xf32> -> vector<8x128xf32>
    %c0_4 = arith.constant 0 : index
    %c0_5 = arith.constant 0 : index
    %6 = vector.load %arg6[%c0_4, %c0_5] : memref<1x128xbf16, #tpu.memory_space<vmem>>, vector<1x128xbf16>
    %7 = arith.extf %6 : vector<1x128xbf16> to vector<1x128xf32>
    %8 = vector.broadcast %7 : vector<1x128xf32> to vector<8x128xf32>
    %9 = arith.addf %5, %8 : vector<8x128xf32>
    %cst_6 = arith.constant 5.000000e-01 : f32
    %10 = vector.broadcast %cst_6 : f32 to vector<8x128xf32>
    %11 = arith.mulf %10, %9 : vector<8x128xf32>
    %12 = arith.mulf %9, %9 : vector<8x128xf32>
    %13 = arith.mulf %12, %9 : vector<8x128xf32>
    %cst_7 = arith.constant 4.471500e-02 : f32
    %14 = vector.broadcast %cst_7 : f32 to vector<8x128xf32>
    %15 = arith.mulf %14, %13 : vector<8x128xf32>
    %16 = arith.addf %9, %15 : vector<8x128xf32>
    %cst_8 = arith.constant 0.797884583 : f32
    %17 = vector.broadcast %cst_8 : f32 to vector<8x128xf32>
    %18 = arith.mulf %17, %16 : vector<8x128xf32>
    %19 = math.tanh %18 : vector<8x128xf32>
    %cst_9 = arith.constant 1.000000e+00 : f32
    %20 = vector.broadcast %cst_9 : f32 to vector<8x128xf32>
    %21 = arith.addf %20, %19 : vector<8x128xf32>
    %22 = arith.mulf %11, %21 : vector<8x128xf32>
    %c0_10 = arith.constant 0 : index
    %c0_11 = arith.constant 0 : index
    %23 = vector.load %arg11[%c0_10, %c0_11] : memref<8x128xf32, #tpu.memory_space<vmem>>, vector<8x128xf32>
    %24 = arith.truncf %22 : vector<8x128xf32> to vector<8x128xbf16>
    %c0_12 = arith.constant 0 : index
    %c0_13 = arith.constant 0 : index
    %25 = vector.load %arg7[%c0_12, %c0_13] : memref<128x128xbf16, #tpu.memory_space<vmem>>, vector<128x128xbf16>
    %cst_14 = arith.constant dense<0.000000e+00> : vector<8x128xf32>
    %26 = tpu.matmul %24, %25, %cst_14 {dimension_numbers = #tpu.dot_dimension_numbers<[1], [0], [0], [1], [0, 0, 1, 1], [], []>} : vector<8x128xbf16>, vector<128x128xbf16>, vector<8x128xf32> -> vector<8x128xf32>
    %27 = arith.addf %23, %26 : vector<8x128xf32>
    %c0_15 = arith.constant 0 : index
    %c0_16 = arith.constant 0 : index
    %28 = vector.load %arg11[%c0_15, %c0_16] : memref<8x128xf32, #tpu.memory_space<vmem>>, vector<8x128xf32>
    tpu.vector_store %arg11[%c0_15, %c0_16], %27 {strides = array<i32>} : memref<8x128xf32, #tpu.memory_space<vmem>>, vector<8x128xf32>,
    %c1_i32 = arith.constant 1 : i32
    %29 = arith.cmpi eq, %arg1, %c1_i32 : i32
    %30 = arith.extui %29 : i1 to i32
    %c0_i32_17 = arith.constant 0 : i32
    %31 = arith.cmpi ne, %30, %c0_i32_17 : i32
    scf.if %31 {
      %c0_18 = arith.constant 0 : index
      %c0_19 = arith.constant 0 : index
      %32 = vector.load %arg11[%c0_18, %c0_19] : memref<8x128xf32, #tpu.memory_space<vmem>>, vector<8x128xf32>
      %c0_20 = arith.constant 0 : index
      %c0_21 = arith.constant 0 : index
      %33 = vector.load %arg8[%c0_20, %c0_21] : memref<1x128xbf16, #tpu.memory_space<vmem>>, vector<1x128xbf16>
      %34 = arith.extf %33 : vector<1x128xbf16> to vector<1x128xf32>
      %35 = vector.broadcast %34 : vector<1x128xf32> to vector<8x128xf32>
      %36 = arith.addf %32, %35 : vector<8x128xf32>
      %37 = arith.truncf %36 : vector<8x128xf32> to vector<8x128xbf16>
      %c0_22 = arith.constant 0 : index
      %c0_23 = arith.constant 0 : index
      %38 = vector.load %arg9[%c0_22, %c0_23] : memref<8x128xbf16, #tpu.memory_space<vmem>>, vector<8x128xbf16>
      tpu.vector_store %arg9[%c0_22, %c0_23], %37 {strides = array<i32>} : memref<8x128xbf16, #tpu.memory_space<vmem>>, vector<8x128xbf16>,
    } else {
    }
    return
  }
  func.func @transform_0(%arg0: i32, %arg1: i32) -> (i32, i32) {
    %c0_i32 = arith.constant 0 : i32
    %c0_i32_0 = arith.constant 0 : i32
    return %arg0, %c0_i32 : i32, i32
  }
  func.func @transform_1(%arg0: i32, %arg1: i32) -> (i32, i32) {
    %c0_i32 = arith.constant 0 : i32
    %c0_i32_0 = arith.constant 0 : i32
    %c0_i32_1 = arith.constant 0 : i32
    return %c0_i32, %c0_i32_0 : i32, i32
  }
  func.func @transform_2(%arg0: i32, %arg1: i32) -> (i32, i32) {
    %c0_i32 = arith.constant 0 : i32
    %c0_i32_0 = arith.constant 0 : i32
    %c0_i32_1 = arith.constant 0 : i32
    return %c0_i32, %c0_i32_0 : i32, i32
  }
  func.func @transform_3(%arg0: i32, %arg1: i32) -> (i32, i32) {
    %c0_i32 = arith.constant 0 : i32
    %c0_i32_0 = arith.constant 0 : i32
    return %c0_i32, %arg1 : i32, i32
  }
  func.func @transform_4(%arg0: i32, %arg1: i32) -> (i32, i32) {
    %c0_i32 = arith.constant 0 : i32
    %c0_i32_0 = arith.constant 0 : i32
    return %c0_i32, %arg1 : i32, i32
  }
  func.func @transform_5(%arg0: i32, %arg1: i32) -> (i32, i32) {
    %c0_i32 = arith.constant 0 : i32
    %c0_i32_0 = arith.constant 0 : i32
    return %arg1, %c0_i32 : i32, i32
  }
  func.func @transform_6(%arg0: i32, %arg1: i32) -> (i32, i32) {
    %c0_i32 = arith.constant 0 : i32
    %c0_i32_0 = arith.constant 0 : i32
    %c0_i32_1 = arith.constant 0 : i32
    return %c0_i32, %c0_i32_0 : i32, i32
  }
  func.func @transform_7(%arg0: i32, %arg1: i32) -> (i32, i32) {
    %c0_i32 = arith.constant 0 : i32
    %c0_i32_0 = arith.constant 0 : i32
    return %arg0, %c0_i32 : i32, i32
  }
}

</mosaic_0001>

<bundles_post_ra>
// kernel: tpu_custom_call.1
= control target key start
LH: loop header
LB: loop body
LE: loop exit
PB: predicated region body
PF: predicated region fallthrough
CT: control target
= control target key end

     0   :  { %s1713_s0 = inlined_call_operand.hbm [shape: bf16[24,128], index: 0, kind: input, shape index: {}]   ;;  %s1714_s1 = inlined_call_operand.vmem [shape: bf16[1,128], index: 1, kind: input, shape index: {}]   ;;  %s1715_s2 = inlined_call_operand.hbm [shape: bf16[1,128], index: 2, kind: input, shape index: {}]   ;;  %s1716_s3 = inlined_call_operand.hbm [shape: bf16[128,256], index: 3, kind: input, shape index: {}]   ;;  %s1717_s4 = inlined_call_operand.vmem [shape: bf16[1,256], index: 4, kind: input, shape index: {}]   ;;  %s1718_s5 = inlined_call_operand.hbm [shape: bf16[256,128], index: 5, kind: input, shape index: {}]   ;;  %s1719_s6 = inlined_call_operand.vmem [shape: bf16[1,128], index: 6, kind: input, shape index: {}]   ;;  %s1720_s7 = inlined_call_operand.hbm [shape: bf16[24,128], index: 7, kind: output, shape index: {}]  }
   0x1   :  { %1731 = sst [smem:[#allocation23_spill]] %s1713_s0 }
   0x2   :  { %1732 = sst [smem:[#allocation24_spill]] %s1716_s3 }
   0x3   :  { %1733 = sst [smem:[#allocation25_spill]] %s1719_s6 }
   0x4   :  { %1734 = sst [smem:[#allocation26_spill]] %s1720_s7 }
   0x5   :  { %12 = vsyncpa [#allocation5], 0 }
   0x6   :  { %14 = vsyncpa [#allocation5 + $0x1], 0 }
   0x7   :  { %15 = vsyncpa [#allocation8], 0 }
   0x8   :  { %16 = vsyncpa [#allocation6], 0 }
   0x9   :  { %18 = vsyncpa [#allocation6 + $0x1], 0  ;;  %s1380_s24 = smov 0   ;;  %s1382_s25 = smov 0  }
   0xa   :  { %s1384_s26 = smov 0   ;;  %s1386_s27 = smov 0  }
   0xb   :  { %s1388_s28 = smov 0   ;;  %s1390_s29 = smov 0  }
   0xc   :  { %s1392_s30 = smov 0   ;;  %s1394_s8 = smov 0  }
   0xd   :  { %s1396_s9 = smov 0   ;;  %s1398_s10 = smov 0  }
   0xe   :  { %s1400_s11 = smov 0  }
   0xf LB: > { %1735 = sst [smem:[#allocation16_spill]] %s1315_s8  ;;  %s33_s12 = sadd.s32 1, %s1319_s9  ;;  %s1327_s11 = sphi %s1400_s11, %s24_s11   ;;  %s1323_s10 = sphi %s1398_s10, %s1768_s10   ;;  %s1319_s9 = sphi %s1396_s9, %s1767_s9   ;;  %s1315_s8 = sphi %s1394_s8, %s1766_s8   ;;  %s1311_s30 = sphi %s1392_s30, %s1765_s30   ;;  %s1307_s29 = sphi %s1390_s29, %s1774_s29   ;;  %s1303_s28 = sphi %s1388_s28, %s1773_s28   ;;  %s1299_s27 = sphi %s1386_s27, %s1772_s27   ;;  %s1295_s26 = sphi %s1384_s26, %s1771_s26   ;;  %s1291_s25 = sphi %s1382_s25, %s1770_s25   ;;  %s1287_s24 = sphi %s1380_s24, %s1769_s24  }
  0x10   : > { %1736 = sst [smem:[#allocation17_spill]] %s1319_s9  ;;  %s36_s13 = sadd.s32 1, %s1323_s10 }
  0x11   : > { %1737 = sst [smem:[#allocation18_spill]] %s1323_s10  ;;  %p34_p0 = scmp.ge.s32.totalorder %s33_s12, 2 }
  0x12   : > { %s43_s14 = sadd.s32 1, %s1307_s29  ;;  %p50_p1 = scmp.ne.s32.totalorder %s1307_s29, %s1303_s28 }
  0x13   : > { %p51_p2 = scmp.eq.s32.totalorder %s1327_s11, 0  ;;  %s1776_s12 = smov (%p34_p0, %s33_s12), 0 }
  0x14   : > { %1738 = sst [smem:[#allocation19_spill]] %s1776_s12  ;;  %s1778_s13 = smov (!%p34_p0, %s36_s13), %s1323_s10 }
  0x15   : > { %p1447_p3 = por %p51_p2, %p50_p1  ;;  %s108_s16 = ssub.s32 %s1319_s9, %s1776_s12 }
  0x16   : > { %p38_p4 = scmp.ge.s32.totalorder %s1778_s13, 3  ;;  %p109_p5 = scmp.eq.s32.totalorder %s108_s16, 0 }
  0x17   : > { %s111_s17 = sadd.s32 1, %s1295_s26  ;;  %p118_p6 = scmp.ne.s32.totalorder %s1295_s26, %s1291_s25 }
  0x18   : > { %s1780_s13 = smov (%p38_p4, %s1778_s13), 0  ;;  %p971_p9 = scmp.lt.s32.totalorder %s1327_s11, 6 }
  0x19   : > { %1740 = sst [smem:[#allocation20_spill]] %s1780_s13  ;;  %s40_s19 = ssub.s32 %s1323_s10, %s1780_s13 }
  0x1a   : > { %s1459_s18 = scalar_select %p109_p5, %s1295_s26, %s111_s17  }
  0x1b   : > { %p1463_p7 = por %p118_p6, %p51_p2  ;;  %p41_p8 = scmp.eq.s32.totalorder %s40_s19, 0 }
  0x1c   : > { %1741 = sst [smem:[#allocation21_spill]] %s1459_s18  ;;  %s264_s21 = sand.u32 1, %s1327_s11  }
  0x1d   : > { %s1470_s22 = scalar_select %p41_p8, %s1307_s29, %s43_s14  }
  0x1e   : > { %s266_s23 = sand.u32 1, %s1307_s29   ;;  %s847_s12 = sshll.u32 %s1323_s10, 6 }
  0x1f   : > { %1743 = sst [smem:[#allocation22_spill]] %s1470_s22  ;;  %s846_s16 = sshll.u32 %s266_s23, 2 }
  0x20   : > { %s1744_s0 = sld [smem:[#allocation23_spill]]  ;;  %s268_s18 = scalar_lea.vmem [#allocation4], %s846_s16 }
  0x21   : > { %s275_s6 = sshll.u32 %s268_s18, 4  ;;  %p1479_p10 = pnand %p971_p9, %p1447_p3  ;;  %s276_s6 = int_to_ptr.vmem [resolvable:$true] %s275_s6 }
  0x22   : > { %p1485_p11 = pnand %p971_p9, %p1463_p7  ;;  %s284_s19 = sand.u32 1, %s1295_s26  }
  0x23   : > { %s1490_s23 = scalar_lea.sflag [#allocation5], %s264_s21  ;;  %p1091_p12 = pneg %p1479_p10 }
  0x24   : > { %s1102_s7 = scalar_lea.vmem %s276_s6, 64  ;;  %s1329_s8 = smov [#allocation4]  }
  0x25   : > { %p1103_p13 = scmp.ne.s32.totalorder %s276_s6, %s1102_s7 }
  0x26   : > { %s273_s17 = scalar_lea.hbm %s1744_s0, %s847_s12  ;;  %s1107_s12 = sshll.u32 %s1329_s8, 4  ;;  %s1108_s12 = int_to_ptr.vmem [resolvable:$false] %s1107_s12 }
  0x27   : > { %p1105_p0 = pnand %p1103_p13, %p1091_p12  ;;  %s1109_s15 = scalar_lea.vmem %s1108_s12, 128 }
  0x28   : > { %p1110_p3 = scmp.lt.s32.totalorder %s276_s6, %s1108_s12  ;;  %p1111_p4 = scmp.lt.s32.totalorder %s1109_s15, %s1102_s7 }
  0x29   : > { %p1106_p2 = pneg %p1105_p0 }
  0x2a   : > { %p1112_p5 = por %p1111_p4, %p1110_p3 }
  0x2c   : > { %p1113_p6 = pnand %p1112_p5, %p1106_p2 }
  0x2e   : > { %1116 = shalt.err (!%p1113_p6)
}
  0x2f   : > { %959 = dma.hbm_to_vmem [thread:$0]  (!%p1479_p10), %s273_s17, 64, %s276_s6, %s1490_s23  }
  0x30   : > { %s1497_s18 = sshll.u32 %s284_s19, 6  ;;  %s849_s20 = sshll.u32 %s1319_s9, 6 }
  0x31   : > { %s1747_s3 = sld [smem:[#allocation24_spill]]  ;;  %s286_s12 = scalar_lea.vmem [#allocation9], %s1497_s18 }
  0x32   : > { %s292_s7 = sshll.u32 %s286_s12, 4  ;;  %p1724_p7 = pneg %p1485_p11  ;;  %s293_s7 = int_to_ptr.vmem [resolvable:$true] %s292_s7 }
  0x33   : > { %s1130_s15 = scalar_lea.vmem %s293_s7, 1024  ;;  %s1330_s6 = smov [#allocation9]  }
  0x34   : > { %p1131_p8 = scmp.ne.s32.totalorder %s293_s7, %s1130_s15  ;;  %s1135_s13 = sshll.u32 %s1330_s6, 4  ;;  %s1136_s13 = int_to_ptr.vmem [resolvable:$false] %s1135_s13 }
  0x35   : > { %s1137_s17 = scalar_lea.vmem %s1136_s13, 2048  ;;  %p1138_p10 = scmp.lt.s32.totalorder %s293_s7, %s1136_s13 }
  0x36   : > { %p1133_p9 = pnand %p1131_p8, %p1724_p7  ;;  %p1139_p13 = scmp.lt.s32.totalorder %s1137_s17, %s1130_s15 }
  0x37   : > { %s291_s8 = scalar_lea.hbm %s1747_s3, %s849_s20 }
  0x38   : > { %p1134_p12 = pneg %p1133_p9  ;;  %p1140_p0 = por %p1139_p13, %p1138_p10 }
  0x3a   : > { %p1141_p2 = pnand %p1140_p0, %p1134_p12 }
  0x3c   : > { %1144 = shalt.err (!%p1141_p2)
}
  0x3d   : > { %s1331_s19 = smov 128   ;;  %s1725_s20 = smov 64  }
  0x3e   : > { %s1726_s21 = smov 4   ;;  %s1515_s16 = sadd.s32 4294967295, %s1327_s11  }
  0x3f   : > { %962 = dma.hbm_to_vmem [thread:$0]  (!%p1485_p11), %s291_s8, 1024, %s293_s7, %s1490_s23, %s1331_s19, %s1725_s20, %s1726_s21  }
  0x40   : > { %s842_s12 = sadd.s32 4294967294, %s1327_s11   ;;  %p56_p3 = scmp.ne.s32.totalorder %s1303_s28, %s1299_s27 }
  0x41   : > { %p57_p4 = scmp.eq.s32.totalorder %s1515_s16, 0  ;;  %p124_p5 = scmp.ne.s32.totalorder %s1291_s25, %s1287_s24 }
  0x42   : > { %p221_p6 = scmp.eq.s32.totalorder %s1515_s16, 5  ;;  %p227_p9 = scmp.eq.s32.totalorder %s842_s12, 5 }
  0x43   : > { %p1526_p8 = por %p57_p4, %p56_p3  ;;  %p1532_p12 = por %p124_p5, %p57_p4 }
  0x44   : > { %p1539_p10 = por %p221_p6, %p50_p1  ;;  %p1543_p13 = por %p227_p9, %p56_p3 }
  0x45   : > { %s1749_s8 = scalar_select %p1532_p12, 1, 0 }
  0x46   : > { %s1750_s7 = scalar_select %p1539_p10, 1, 0 }
  0x47   : > { %s1751_s24 = scalar_select %p1543_p13, 1, 0 }
  0x48   : > { %p843_p0 = scmp.ge.s32.totalorder %s1327_s11, 1  ;;  %p234_p2 = scmp.lt.s32.totalorder %s1327_s11, 7 }
  0x49   : > { %s1334_s13 = smov [#allocation7]   ;;  %s881_s19 = sshll.u32 %s1319_s9, 10 }
  0x4a   : > { %p1549_p7 = pnand %p843_p0, %p234_p2  ;;  %s250_s17 = sshll.u32 %s1334_s13, 4  ;;  %s1559_s17 = int_to_ptr.vmem [resolvable:$true] %s250_s17 }
  0x4b   : > { %s318_s21 = scalar_lea.hbm %s1718_s5, %s881_s19  ;;  %s312_s0 = scalar_lea.vmem [#allocation10], %s1497_s18 }
  0x4c   : > { %p952_p1 = pneg %p1549_p7  ;;  %s319_s3 = sshll.u32 %s312_s0, 4  ;;  %s320_s3 = int_to_ptr.vmem [resolvable:$true] %s319_s3 }
  0x4d   : > { %s1158_s22 = scalar_lea.vmem %s320_s3, 1024  ;;  %p1754_p6 = pneg %p1485_p11 }
  0x4e   : > { %p1564_p3 = pnand %p952_p1, %p57_p4  ;;  %p1159_p5 = scmp.ne.s32.totalorder %s320_s3, %s1158_s22 }
  0x4f   : > { %s1335_s13 = smov [#allocation10]  }
  0x50   : > { %p1161_p9 = pnand %p1159_p5, %p1754_p6  ;;  %s1163_s9 = sshll.u32 %s1335_s13, 4  ;;  %s1164_s9 = int_to_ptr.vmem [resolvable:$false] %s1163_s9 }
  0x51   : > { %s1165_s20 = scalar_lea.vmem %s1164_s9, 2048  ;;  %p1166_p2 = scmp.lt.s32.totalorder %s320_s3, %s1164_s9 }
  0x52   : > { %p1162_p0 = pneg %p1161_p9  ;;  %p1167_p13 = scmp.lt.s32.totalorder %s1165_s20, %s1158_s22 }
  0x54   : > { %p1168_p10 = por %p1167_p13, %p1166_p2 }
  0x56   : > { %p1169_p12 = pnand %p1168_p10, %p1162_p0 }
  0x58   : > { %1172 = shalt.err (!%p1169_p12)
}
  0x59   : > { %s1755_s0 = smov 4   ;;  %s1756_s18 = smov 64  }
  0x5a   : > { %965 = dma.hbm_to_vmem [thread:$0]  (!%p1485_p11), %s318_s21, 1024, %s320_s3, %s1490_s23, %s1756_s18, %s1756_s18, %s1755_s0  }
  0x5b   : > { %p1175_p1 = pneg %p1564_p3  ;;  %s1184_s19 = scalar_lea.vmem %s1559_s17, 16 }
  0x5c   : > { %p1185_p5 = scmp.ne.s32.totalorder %s1559_s17, %s1184_s19  ;;  %s1191_s9 = scalar_lea.vmem %s1559_s17, 32 }
  0x5d   : > { %p1192_p12 = scmp.lt.s32.totalorder %s1559_s17, %s1559_s17  ;;  %p1193_p10 = scmp.lt.s32.totalorder %s1191_s9, %s1184_s19 }
  0x5e   : > { %p1187_p6 = pnand %p1185_p5, %p1175_p1 }
  0x5f   : > { %p1194_p9 = por %p1193_p10, %p1192_p12 }
  0x60   : > { %p1188_p13 = pneg %p1187_p6 }
  0x62   : > { %p1195_p0 = pnand %p1194_p9, %p1188_p13 }
  0x64   : > { %1198 = shalt.err (!%p1195_p0)
}
  0x65   : > { %955 = dma.hbm_to_vmem [thread:$0]  (!%p1564_p3), %s1715_s2, 16, %s1559_s17, [#allocation8]  }
  0x66   : > { %331 = sbr.rel (%p1549_p7) target bundleno = 791 (0x317), region = 48  ;;  %s333_s3 = sand.u32 (!%p1549_p7), 1, %s1515_s16  }
  0x67   : > { %s335_s23 = sand.u32 (!%p1549_p7), 1, %s1303_s28   ;;  %s334_s12 = scalar_lea.sflag (!%p1549_p7), [#allocation5], %s333_s3 }
  0x68   : > { %s1596_s21 = sshll.u32 (!%p1549_p7), %s335_s23, 2 }
  0x69   : > { %s337_s10 = scalar_lea.vmem (!%p1549_p7), [#allocation4], %s1596_s21 }
  0x6b   : > { %1270 = dma.done.wait (%p1526_p8), %s334_s12, 64  }
  0x6c   : > { %1272 = vsyncadd (%p1526_p8), %s334_s12, 4294967232 }
  0x6d   : > { %1274 = dma.done.wait (%p57_p4), [#allocation8], 16  }
  0x6e   : > { %1276 = vsyncadd (%p57_p4), [#allocation8], 4294967280  ;;  %s348_s6 = sand.u32 1, %s1291_s25   ;;  %p1757_p11 = scmp.ne.s32.totalorder %s1749_s8, 0 }
  0x6f   : > { %s856_s17 = sshll.u32 %s348_s6, 6 }
  0x70   : > { %s1608_s13 = scalar_lea.vmem [#allocation9], %s856_s17 }
  0x71   : > { %1278 = dma.done.wait (%p1757_p11), %s334_s12, 2048  }
  0x72   : > { %1280 = vsyncadd (%p1757_p11), %s334_s12, 4294965248  ;;  %p403_p7 = scmp.lt.s32.totalorder %s1311_s30, 1  ;;  %s1622_s18 = scalar_lea.vmem [#allocation10], %s856_s17 }
  0x73   : > { %s402_s19 = scalar_lea.vmem [#allocation11], %s1596_s21  ;;  %p859_p4 = scmp.ne.s32.totalorder %s1311_s30, 0 }
  0x74   : > { %s1616_s15 = scalar_select %p403_p7, %s1311_s30, 1 }
  0x75   : > { %411 = sbr.rel (%p859_p4) target bundleno = 298 (0x12a), region = 68 }
  0x76   : > { %s405_s0 = scalar_lea.vmem %s1717_s4, %s1616_s15 }
  0x7a   : > { %v412_v0 = vld [vmem:[%s337_s10] sm:$0xf]  ;;  %v1336_v3 = vmov 0.0   ;;  %v430_v12 = vlaneseq  ;;  %v428_v14 = vld [vmem:[%s1714_s1] sm:$0x1] }
  0x7b   : > { %v413_v1 = vunpack.c.l.bf16 %v412_v0  ;;  %444 = vst [vmem:[#allocation3] sm:$0xff] %v1336_v3  ;;  %v435_v15 = vld [vmem:[#allocation7] sm:$0x1]  ;;  %v429_v16 = vunpack.c.l.bf16 %v428_v14 }
  0x7c   : > { %v431_v13 = vshrl.u32 %v430_v12, 7  ;;  %v436_v18 = vunpack.c.l.bf16 %v435_v15 }
  0x7d   : > { %414 = vadd.xlane.f32.xlu0 %v413_v1  ;;  %v416_v2 = vmul.f32 %v413_v1, %v413_v1 }
  0x7e   : > { %v432_v17 = vsub.s32 0, %v431_v13 }
  0x80   : > { %v433_v20 = vrot.slane %v429_v16, %v432_v17  ;;  %v440_v22 = vrot.slane %v436_v18, %v432_v17 }
  0x81   : > { %417 = vadd.xlane.f32.xlu0 %v416_v2 }
 0x106   : > { %v415_v4 = vpop.xlane.xlu0 %414 }
 0x107   : > { %v419_v5 = vmul.f32 0.03125, %v415_v4 }
 0x109   : > { %v421_v7 = vmul.f32 %v419_v5, %v419_v5  ;;  %v424_v19 = vsub.f32 %v413_v1, %v419_v5 }
 0x10a   : > { %v418_v6 = vpop.xlane.xlu0 %417 }
 0x10b   : > { %v420_v8 = vmul.f32 0.03125, %v418_v6 }
 0x10d   : > { %v422_v9 = vsub.f32 %v420_v8, %v421_v7 }
 0x10f   : > { %v423_v10 = vmax.f32 %v422_v9, 0.0 }
 0x111   : > { %v425_v11 = vadd.f32 1e-05, %v423_v10 }
 0x113   : > { %1069 = vrsqrt.f32 %v425_v11 }
 0x120   : > { %v1070_v21 = vpop.eup %1069 }
 0x121   : > { %v427_v23 = vmul.f32 %v1070_v21, %v424_v19 }
 0x123   : > { %v434_v24 = vmul.f32 %v433_v20, %v427_v23 }
 0x125   : > { %v441_v25 = vadd.f32 %v440_v22, %v434_v24 }
 0x127   : > { %v442_v26 = vpack.c.bf16 %v441_v25, %v441_v25 }
 0x129   : > { %443 = vst [vmem:[#allocation2] sm:$0xf] %v442_v26 }
 0x12a PF: > { %v1071_v27 = vld [vmem:[%s1608_s13 + $0x38] sm:$0xff]   ;;  %v1337_v28 = vmov 0.0   ;;  %v1072_v29 = vld [vmem:[%s1608_s13 + $0x30] sm:$0xff]   ;;  %vm1338_vm0 = vmmov 0   ;;  %v1073_v30 = vld [vmem:[%s1608_s13 + $0x28] sm:$0xff]   ;;  %v464_v45 = vlaneseq  ;;  %p876_p8 = scmp.ne.s32.totalorder %s1311_s30, 1 }
 0x12b   : > { %900 = vmatprep.subr.bf16.mxu0 %v1337_v28  ;;  %920 = vmatprep.subr.bf16.mxu1 %v1337_v28  ;;  %v1074_v31 = vld [vmem:[%s1608_s13 + $0x20] sm:$0xff]   ;;  %v1075_v32 = vld [vmem:[%s1608_s13 + $0x18] sm:$0xff]   ;;  %v1076_v33 = vld [vmem:[%s1608_s13 + $0x10] sm:$0xff]   ;;  %s1758_s10 = sld [smem:[#allocation25_spill]] (!%p876_p8) }
 0x12c   : > { %901 = vmatpush3.bf16.msra.mxu0 %v1071_v27  ;;  %916 = vmatprep.mubr.msk.bf16.mxu0 %vm1338_vm0, %v1337_v28  ;;  %v1077_v34 = vld [vmem:[%s1608_s13 + $0x8] sm:$0xff]   ;;  %v1078_v35 = vld [vmem:[%s1608_s13] sm:$0xff]   ;;  %v1079_v37 = vld [vmem:[%s1622_s18 + $0x38] sm:$0xff]   ;;  %v465_v46 = vshrl.u32 %v464_v45, 7 }
 0x12d   : > { %902 = vmatprep.subr.bf16.mxu0 %v1337_v28  ;;  %936 = vmatprep.mubr.msk.bf16.mxu1 %vm1338_vm0, %v1337_v28  ;;  %v1080_v38 = vld [vmem:[%s1622_s18 + $0x30] sm:$0xff]   ;;  %v1081_v39 = vld [vmem:[%s1622_s18 + $0x28] sm:$0xff]   ;;  %v1082_v40 = vld [vmem:[%s1622_s18 + $0x20] sm:$0xff]  }
 0x12e   : > { %921 = vmatpush3.bf16.msra.mxu1 %v1079_v37  ;;  %v1083_v41 = vld [vmem:[%s1622_s18 + $0x18] sm:$0xff]   ;;  %v1084_v42 = vld [vmem:[%s1622_s18 + $0x10] sm:$0xff]   ;;  %v1085_v43 = vld [vmem:[%s1622_s18 + $0x8] sm:$0xff]   ;;  %v466_v49 = vsub.s32 0, %v465_v46 }
 0x12f   : > { %922 = vmatprep.subr.bf16.mxu1 %v1337_v28  ;;  %v1086_v44 = vld [vmem:[%s1622_s18] sm:$0xff]   ;;  %v462_v47 = vld [vmem:[%s405_s0] sm:$0x1]  ;;  %v565_v2 = vld [vmem:[#allocation3] sm:$0xff] }
 0x130   : > { %903 = vmatpush3.bf16.msra.mxu0 %v1072_v29  ;;  %v445_v36 = vld [vmem:[#allocation2] sm:$0xf]  ;;  %v463_v48 = vunpack.c.l.bf16 %v462_v47 }
 0x131   : > { %904 = vmatprep.subr.bf16.mxu0 %v1337_v28 }
 0x132   : > { %923 = vmatpush3.bf16.msra.mxu1 %v1080_v38  ;;  %v467_v50 = vrot.slane %v463_v48, %v466_v49 }
 0x133   : > { %924 = vmatprep.subr.bf16.mxu1 %v1337_v28 }
 0x134   : > { %905 = vmatpush3.bf16.msra.mxu0 %v1073_v30 }
 0x135   : > { %906 = vmatprep.subr.bf16.mxu0 %v1337_v28 }
 0x136   : > { %925 = vmatpush3.bf16.msra.mxu1 %v1081_v39 }
 0x137   : > { %926 = vmatprep.subr.bf16.mxu1 %v1337_v28 }
 0x138   : > { %907 = vmatpush3.bf16.msra.mxu0 %v1074_v31 }
 0x139   : > { %908 = vmatprep.subr.bf16.mxu0 %v1337_v28 }
 0x13a   : > { %927 = vmatpush3.bf16.msra.mxu1 %v1082_v40 }
 0x13b   : > { %928 = vmatprep.subr.bf16.mxu1 %v1337_v28 }
 0x13c   : > { %909 = vmatpush3.bf16.msra.mxu0 %v1075_v32 }
 0x13d   : > { %910 = vmatprep.subr.bf16.mxu0 %v1337_v28 }
 0x13e   : > { %929 = vmatpush3.bf16.msra.mxu1 %v1083_v41 }
 0x13f   : > { %930 = vmatprep.subr.bf16.mxu1 %v1337_v28 }
 0x140   : > { %911 = vmatpush3.bf16.msra.mxu0 %v1076_v33 }
 0x141   : > { %912 = vmatprep.subr.bf16.mxu0 %v1337_v28 }
 0x142   : > { %931 = vmatpush3.bf16.msra.mxu1 %v1084_v42 }
 0x143   : > { %932 = vmatprep.subr.bf16.mxu1 %v1337_v28 }
 0x144   : > { %913 = vmatpush3.bf16.msra.mxu0 %v1077_v34 }
 0x145   : > { %914 = vmatprep.subr.bf16.mxu0 %v1337_v28 }
 0x146   : > { %933 = vmatpush3.bf16.msra.mxu1 %v1085_v43 }
 0x147   : > { %934 = vmatprep.subr.bf16.mxu1 %v1337_v28 }
 0x148   : > { %915 = vmatpush3.bf16.msra.mxu0 %v1078_v35 }
 0x14a   : > { %935 = vmatpush3.bf16.msra.mxu1 %v1086_v44 }
 0x14b   : > { %917 = vmatmul.mubr.bf16.vlgmr.msra.gmra.mxu0 %v445_v36 }
 0x20b   : > { %v550_v51 = vpop.f32.mrf.mxu0 }
 0x20c   : > { %v551_v52 = vadd.f32 %v550_v51, %v467_v50 }
 0x20d   : > { %v918_v53 = vpop.f32.mrf.mxu0 }
 0x20e   : > { %v557_v54 = vmul.f32 %v551_v52, %v551_v52  ;;  %v556_v62 = vmul.f32 0.5, %v551_v52 }
 0x20f   : > { %v553_v55 = vpop.f32.mrf.mxu0 }
 0x210   : > { %v558_v56 = vmul.f32 %v557_v54, %v551_v52 }
 0x211   : > { %v919_v57 = vpop.f32.mrf.mxu0 }
 0x212   : > { %v559_v58 = vmul.f32 0.044715, %v558_v56 }
 0x214   : > { %v560_v59 = vadd.f32 %v559_v58, %v551_v52 }
 0x216   : > { %v561_v60 = vmul.f32 0.7978846, %v560_v59 }
 0x218   : > { %1087 = vtanh.f32 %v561_v60 }
 0x225   : > { %v1088_v61 = vpop.eup %1087 }
 0x226   : > { %v563_v63 = vadd.f32 1.0, %v1088_v61 }
 0x228   : > { %v564_v0 = vmul.f32 %v563_v63, %v556_v62 }
 0x22a   : > { %v566_v1 = vpack.c.bf16 %v564_v0, %v564_v0 }
 0x22c   : > { %937 = vmatmul.mubr.bf16.vlgmr.msra.gmra.mxu1 %v566_v1 }
 0x2ec   : > { %v665_v3 = vpop.f32.mrf.mxu1 }
 0x2ed   : > { %v671_v4 = vadd.f32 %v665_v3, %v565_v2 }
 0x2ee   : > { %v938_v5 = vpop.f32.mrf.mxu1  ;;  %676 = sbr.rel (%p876_p8) target bundleno = 765 (0x2fd), region = 72 }
 0x2ef   : > { %672 = vst [vmem:[#allocation3] sm:$0xff] %v671_v4 }
 0x2f0   : > { %v668_v6 = vpop.f32.mrf.mxu1 }
 0x2f2   : > { %v939_v7 = vpop.f32.mrf.mxu1 }
 0x2f3   : > { %v678_v8 = vld [vmem:[%s1758_s10] sm:$0x1] }
 0x2f4   : > { %v679_v9 = vunpack.c.l.bf16 %v678_v8 }
 0x2f6   : > { %v677_v10 = vld [vmem:[#allocation3] sm:$0xff]  ;;  %v683_v11 = vrot.slane %v679_v9, %v466_v49 }
 0x2f8   : > { %v684_v12 = vadd.f32 %v683_v11, %v677_v10 }
 0x2fa   : > { %v685_v13 = vpack.c.bf16 %v684_v12, %v684_v12 }
 0x2fc   : > { %686 = vst [vmem:[%s402_s19] sm:$0xf] %v685_v13 }
 0x2fd PF: > { %s1759_s6 = sld [smem:[#allocation16_spill]]  ;;  %s701_s20 = sshll.u32 %s402_s19, 4  ;;  %s702_s20 = int_to_ptr.vmem [resolvable:$true] %s701_s20 }
 0x2fe   : > { %s1760_s15 = sld [smem:[#allocation26_spill]]  ;;  %s688_s0 = scalar_lea.sflag [#allocation6], %s335_s23 }
 0x2ff   : > { %s1199_s18 = scalar_lea.vmem %s702_s20, 64  ;;  %p1761_p2 = scmp.ne.s32.totalorder %s1750_s7, 0 }
 0x300   : > { %p1200_p3 = scmp.ne.s32.totalorder %s702_s20, %s1199_s18  ;;  %s1339_s8 = smov [#allocation11]  }
 0x301   : > { %s1203_s9 = sshll.u32 %s1339_s8, 4  ;;  %s1204_s9 = int_to_ptr.vmem [resolvable:$false] %s1203_s9 }
 0x302   : > { %p1201_p1 = pnand %p1200_p3, %p1761_p2  ;;  %s1205_s22 = scalar_lea.vmem %s1204_s9, 128 }
 0x303   : > { %s878_s17 = sshll.u32 %s1759_s6, 6  ;;  %p1206_p6 = scmp.lt.s32.totalorder %s702_s20, %s1204_s9 }
 0x304   : > { %s699_s16 = scalar_lea.hbm %s1760_s15, %s878_s17  ;;  %p1202_p5 = pneg %p1201_p1 }
 0x305   : > { %p1207_p13 = scmp.lt.s32.totalorder %s1205_s22, %s1199_s18 }
 0x307   : > { %p1208_p12 = por %p1207_p13, %p1206_p6 }
 0x309   : > { %p1209_p10 = pnand %p1208_p12, %p1202_p5 }
 0x30b   : > { %1212 = shalt.err (!%p1209_p10)
}
 0x30c   : > { %s1213_s14 = scalar_lea.hbm %s699_s16, 64  ;;  %s1217_s19 = scalar_lea.hbm %s1760_s15, 192 }
 0x30d   : > { %p1214_p9 = scmp.ne.s32.totalorder %s699_s16, %s1213_s14  ;;  %p1218_p7 = scmp.lt.s32.totalorder %s699_s16, %s1760_s15 }
 0x30e   : > { %p1219_p4 = scmp.lt.s32.totalorder %s1217_s19, %s1213_s14 }
 0x30f   : > { %p1215_p0 = pnand %p1214_p9, %p1761_p2 }
 0x310   : > { %p1220_p8 = por %p1219_p4, %p1218_p7 }
 0x311   : > { %p1216_p11 = pneg %p1215_p0 }
 0x313   : > { %p1221_p3 = pnand %p1220_p8, %p1216_p11 }
 0x315   : > { %1224 = shalt.err (!%p1221_p3)
}
 0x316   : > { %950 = dma.vmem_to_hbm [thread:$0]  (%p1761_p2), %s702_s20, 64, %s699_s16, %s688_s0  }
 0x317 PF: > { %p973_p1 = scmp.ge.s32.totalorder %s1327_s11, 2  ;;  %s713_s10 = sand.u32 1, %s1299_s27  }
 0x318   : > { %p1762_p5 = scmp.ne.s32.totalorder %s1751_s24, 0  ;;  %s714_s6 = scalar_lea.sflag [#allocation6], %s713_s10 }
 0x31a   : > { %p967_p6 = pnand %p973_p1, %p1762_p5 }
 0x31c   : > { %p968_p13 = pneg %p967_p6 }
 0x31e   : > { %1282 = dma.done.wait (%p968_p13), %s714_s6, 64  }
 0x31f   : > { %1284 = vsyncadd (%p968_p13), %s714_s6, 4294967232  ;;  %s24_s11 = sadd.s32 1, %s1327_s11   ;;  %s1763_s17 = sld [smem:[#allocation21_spill]] }
 0x320   : > { %p21_p12 = scmp.ge.s32.totalorder %s24_s11, 8   ;;  %s1764_s7 = sld [smem:[#allocation22_spill]] }
 0x321   : > { %s1765_s30 = sld [smem:[#allocation17_spill]]  ;;  %s1769_s24 = smov %s1291_s25 }
 0x322   : > { %s1766_s8 = sld [smem:[#allocation18_spill]]  ;;  %s1770_s25 = smov %s1295_s26 }
 0x323   : > { %s1767_s9 = sld [smem:[#allocation19_spill]]  ;;  %s1772_s27 = smov %s1303_s28 }
 0x324   : > { %s1768_s10 = sld [smem:[#allocation20_spill]]  ;;  %s1773_s28 = smov %s1307_s29 }
 0x325   : > { %s1771_s26 = smov %s1763_s17  ;;  %23 = sbr.rel (!%p21_p12) target bundleno = 15 (0xf), region = 130 }
 0x326   : > { %s1774_s29 = smov %s1764_s7 }
 0x32a   :  { %719 = vsyncpa [#allocation5], 1 }
 0x32b   :  { %721 = vsyncpa [#allocation5 + $0x1], 1 }
 0x32c   :  { %722 = vsyncpa [#allocation8], 1 }
 0x32d   :  { %723 = vsyncpa [#allocation6], 1 }
 0x32e   :  { %725 = vsyncpa [#allocation6 + $0x1], 1 }

</bundles_post_ra>
